<compile_context>
chip_gen: v5e
topology: v5e:2x2
jax: 0.10.0
libtpu: 0.0.40
codegen_flags: <defaults>
</compile_context>

<pallas_src>
import functools
import math

import jax
import jax.numpy as jnp
from jax.experimental import pallas as pl
from jax.experimental.pallas import tpu as pltpu

LN_EPS = 1e-5          # PyTorch nn.LayerNorm default
NEG_BIG = -1e30        # mask value for padded sequence positions
TS = 128               # sequence tile (lane-dense attention-weight output)


def _attention_kernel(seq_len, d_model,
                      h_ref, qh_ref, wd_ref, we_ref, gamma_ref, beta_ref,
                      a_ref, c_ref,
                      hd_ref, m_ref, l_ref, acc_ref):
    s = pl.program_id(0)
    n = pl.num_programs(0)

    gamma = gamma_ref[...].astype(jnp.float32)     # (1, D)
    beta = beta_ref[...].astype(jnp.float32)       # (1, D)

    def layernorm(x):                              # biased variance, eps in sqrt
        mu = jnp.mean(x, axis=-1, keepdims=True)
        xc = x - mu
        var = jnp.mean(xc * xc, axis=-1, keepdims=True)
        return xc * jax.lax.rsqrt(var + LN_EPS) * gamma + beta

    # ---- step 0: project + LayerNorm decoder hidden once; fold in 1/sqrt(D) ----
    @pl.when(s == 0)
    def _init():
        # h (1, L*D) . w_d (D, L*D), contracting the "in" axis -> (1, D)
        hd = jax.lax.dot_general(
            h_ref[...], wd_ref[...],
            dimension_numbers=(((1,), (1,)), ((), ())),
            preferred_element_type=jnp.float32)
        hd_ref[...] = layernorm(hd) * (1.0 / math.sqrt(d_model))
        m_ref[...] = jnp.full_like(m_ref, NEG_BIG)
        l_ref[...] = jnp.zeros_like(l_ref)
        acc_ref[...] = jnp.zeros_like(acc_ref)

    # ---- per tile: q projection + LayerNorm (f32 math regardless of input dtype) ----
    # qh tile (TS, 2D) . w_e (D, 2D), contracting the "in" axis -> (TS, D)
    q = jax.lax.dot_general(
        qh_ref[...], we_ref[...],
        dimension_numbers=(((1,), (1,)), ((), ())),
        preferred_element_type=jnp.float32)
    q = layernorm(q)

    # logits (1, TS) = hd_scaled (1, D) . q (TS, D)^T
    logits = jax.lax.dot_general(
        hd_ref[...], q,
        dimension_numbers=(((1,), (1,)), ((), ())),
        preferred_element_type=jnp.float32)

    # mask padded sequence positions
    col = s * TS + jax.lax.broadcasted_iota(jnp.int32, logits.shape, 1)
    logits = jnp.where(col < seq_len, logits, NEG_BIG)

    # stash raw (masked) logits in the resident output; normalized at the end
    start = pl.multiple_of(s * TS, TS)
    a_ref[:, pl.ds(start, TS)] = logits.astype(a_ref.dtype)

    # ---- online-softmax accumulation for the context vector ----
    m_prev = m_ref[...]                                            # (1, 1)
    m_new = jnp.maximum(m_prev, jnp.max(logits, axis=-1, keepdims=True))
    alpha = jnp.exp(m_prev - m_new)
    p = jnp.exp(logits - m_new)                                    # (1, TS)
    l_ref[...] = alpha * l_ref[...] + jnp.sum(p, axis=-1, keepdims=True)
    acc_ref[...] = alpha * acc_ref[...] + jnp.dot(
        p, q, preferred_element_type=jnp.float32)                  # (1, D)
    m_ref[...] = m_new

    # ---- finalize: normalize attention weights and context ----
    @pl.when(s == n - 1)
    def _finalize():
        inv_l = pl.reciprocal(l_ref[...], approx=True)             # EUP slot
        a_ref[...] = (jnp.exp(a_ref[...] - m_ref[...]) * inv_l).astype(a_ref.dtype)
        c_ref[...] = (acc_ref[...] * inv_l).astype(c_ref.dtype)


def attention_forward(h, question_hidden, w_d, w_e, gamma, beta,
                      d_model, layers_num):
    """Eval-mode forward of the PyTorch Attention module.

    h               : any shape holding layers_num * d_model elements
    question_hidden : (1, S, 2 * d_model)   (module assumes batch == 1)
    w_d             : (d_model, layers_num * d_model)  PyTorch (out, in) layout
    w_e             : (d_model, 2 * d_model)           PyTorch (out, in) layout
    gamma, beta     : (d_model,) LayerNorm affine
    Returns a (1, 1, S), c (1, 1, d_model).
    """
    assert question_hidden.ndim == 3 and question_hidden.shape[0] == 1, \
        "module semantics assume batch == 1"
    S = question_hidden.shape[1]
    num_tiles = pl.cdiv(S, TS)
    s_pad = num_tiles * TS

    # No transposes / dtype copies of the weights; only a reshape of the inputs
    # (and a zero-pad of qh up to the sequence tile).
    h_flat = h.reshape(1, layers_num * d_model)
    qh = question_hidden.reshape(S, 2 * d_model)
    if s_pad != S:
        qh = jnp.pad(qh, ((0, s_pad - S), (0, 0)))
    g = gamma.reshape(1, d_model)
    b = beta.reshape(1, d_model)

    itemsize = lambda x: jnp.dtype(x.dtype).itemsize
    nbytes = lambda x: math.prod(x.shape) * itemsize(x)
    # working set: double-buffered qh tile + resident weights/outputs/scratch
    working = (2 * TS * 2 * d_model * itemsize(qh)
               + nbytes(h_flat) + nbytes(w_d) + nbytes(w_e) + nbytes(g) + nbytes(b)
               + 4 * (s_pad + 3 * d_model + 2))
    vmem_limit = int(min(64 * 1024 * 1024,
                         max(8 * 1024 * 1024, 2 * working + (1 << 20))))

    flops = 2 * (layers_num * d_model * d_model          # h projection
                 + s_pad * (2 * d_model) * d_model       # q projection
                 + 2 * s_pad * d_model)                  # logits + context
    cost = pl.CostEstimate(
        flops=flops,
        transcendentals=3 * s_pad,
        bytes_accessed=nbytes(qh) + nbytes(w_d) + nbytes(w_e) + nbytes(h_flat)
        + nbytes(g) + nbytes(b) + 4 * (s_pad + d_model))

    kernel = functools.partial(_attention_kernel, S, d_model)
    a_pad, c = pl.pallas_call(
        kernel,
        out_shape=(
            jax.ShapeDtypeStruct((1, s_pad), jnp.float32),
            jax.ShapeDtypeStruct((1, d_model), jnp.float32),
        ),
        grid_spec=pltpu.PrefetchScalarGridSpec(
            num_scalar_prefetch=0,
            grid=(num_tiles,),
            in_specs=[
                pl.BlockSpec((1, layers_num * d_model), lambda s: (0, 0)),   # h
                pl.BlockSpec((TS, 2 * d_model), lambda s: (s, 0)),           # qh tile
                pl.BlockSpec((d_model, layers_num * d_model), lambda s: (0, 0)),  # w_d
                pl.BlockSpec((d_model, 2 * d_model), lambda s: (0, 0)),      # w_e
                pl.BlockSpec((1, d_model), lambda s: (0, 0)),                # gamma
                pl.BlockSpec((1, d_model), lambda s: (0, 0)),                # beta
            ],
            out_specs=(
                pl.BlockSpec((1, s_pad), lambda s: (0, 0)),      # resident a (logit stash)
                pl.BlockSpec((1, d_model), lambda s: (0, 0)),    # resident c
            ),
            scratch_shapes=[
                pltpu.VMEM((1, d_model), jnp.float32),   # hd (LayerNormed, pre-scaled)
                pltpu.VMEM((1, 1), jnp.float32),         # running max
                pltpu.VMEM((1, 1), jnp.float32),         # running denominator
                pltpu.VMEM((1, d_model), jnp.float32),   # running context accumulator
            ],
        ),
        compiler_params=pltpu.CompilerParams(
            dimension_semantics=("arbitrary",),          # online-softmax reduction axis
            vmem_limit_bytes=vmem_limit,
        ),
        cost_estimate=cost,
    )(h_flat, qh, w_d, w_e, g, b)

    a = a_pad[:, :S].reshape(1, 1, S)
    return a, c.reshape(1, 1, d_model)


def _reference(h, question_hidden, w_d, w_e, gamma, beta, d_model, layers_num):
    # pure-JAX reference mirroring the PyTorch forward (eval mode)
    hf = h.reshape(1, 1, layers_num * d_model)
    hd = hf @ w_d.T                                                   # (1,1,D)
    hd = (hd - hd.mean(-1, keepdims=True)) / jnp.sqrt(
        hd.var(-1, keepdims=True) + LN_EPS) * gamma + beta
    q = question_hidden @ w_e.T                                       # (1,S,D)
    q = (q - q.mean(-1, keepdims=True)) / jnp.sqrt(
        q.var(-1, keepdims=True) + LN_EPS) * gamma + beta
    a = (q / d_model ** 0.5) @ jnp.swapaxes(hd, 1, 2)                 # (1,S,1)
    a = jnp.swapaxes(a, 1, 2)                                         # (1,1,S)
    a = jax.nn.softmax(a, axis=-1)
    c = a @ q                                                         # (1,1,D)
    return a, c


if __name__ == "__main__":
    d_model, layers_num, S = 32, 2, 8

    key = jax.random.PRNGKey(0)
    k1, k2, k3, k4 = jax.random.split(key, 4)

    # deterministic synthetic parameters (PyTorch Linear weight layout: (out, in))
    w_d = jax.random.normal(k1, (d_model, layers_num * d_model), jnp.float32) * 0.1
    w_e = jax.random.normal(k2, (d_model, 2 * d_model), jnp.float32) * 0.1
    gamma = jnp.ones((d_model,), jnp.float32)
    beta = jnp.zeros((d_model,), jnp.float32)

    # inputs: LSTM-style hidden state and question encoder states
    h = jax.random.normal(k3, (layers_num, 1, d_model), jnp.float32)
    question_hidden = jax.random.normal(k4, (1, S, 2 * d_model), jnp.float32)

    a, c = attention_forward(h, question_hidden, w_d, w_e, gamma, beta,
                             d_model, layers_num)
    jax.block_until_ready((a, c))

    a_ref, c_ref = _reference(h, question_hidden, w_d, w_e, gamma, beta,
                              d_model, layers_num)
    assert a.shape == (1, 1, S) and c.shape == (1, 1, d_model)
    # tolerance relaxed vs 1e-5 because the softmax denominator uses the EUP
    # approximate reciprocal (~1e-4 relative error).
    assert jnp.allclose(a, a_ref, atol=2e-3, rtol=2e-3)
    assert jnp.allclose(c, c_ref, atol=2e-3, rtol=2e-3)

    print("KERNEL_OK")
</pallas_src>

<mosaic_0001>
module attributes {stable_mosaic.version = 11 : i64} {
  func.func @_attention_kernel(%arg0: i32, %arg1: memref<1x64xf32, #tpu.memory_space<vmem>>, %arg2: memref<128x64xf32, #tpu.memory_space<vmem>>, %arg3: memref<32x64xf32, #tpu.memory_space<vmem>>, %arg4: memref<32x64xf32, #tpu.memory_space<vmem>>, %arg5: memref<1x32xf32, #tpu.memory_space<vmem>>, %arg6: memref<1x32xf32, #tpu.memory_space<vmem>>, %arg7: memref<1x128xf32, #tpu.memory_space<vmem>>, %arg8: memref<1x32xf32, #tpu.memory_space<vmem>>, %arg9: memref<1x32xf32, #tpu.memory_space<vmem>>, %arg10: memref<1x1xf32, #tpu.memory_space<vmem>>, %arg11: memref<1x1xf32, #tpu.memory_space<vmem>>, %arg12: memref<1x32xf32, #tpu.memory_space<vmem>>) attributes {dimension_semantics = [#tpu.dimension_semantics<arbitrary>], iteration_bounds = array<i64: 1>, scalar_prefetch = 0 : i64, scratch_operands = 4 : i64, tpu.core_type = #tpu.core_type<tc>, window_params = [{pipeline_mode = #tpu.pipeline_mode<synchronous>, transform_indices = @transform_0, window_bounds = array<i64: 1, 64>}, {transform_indices = @transform_1, window_bounds = array<i64: 128, 64>}, {pipeline_mode = #tpu.pipeline_mode<synchronous>, transform_indices = @transform_2, window_bounds = array<i64: 32, 64>}, {pipeline_mode = #tpu.pipeline_mode<synchronous>, transform_indices = @transform_3, window_bounds = array<i64: 32, 64>}, {pipeline_mode = #tpu.pipeline_mode<synchronous>, transform_indices = @transform_4, window_bounds = array<i64: 1, 32>}, {pipeline_mode = #tpu.pipeline_mode<synchronous>, transform_indices = @transform_5, window_bounds = array<i64: 1, 32>}, {pipeline_mode = #tpu.pipeline_mode<synchronous>, transform_indices = @transform_6, window_bounds = array<i64: 1, 128>}, {pipeline_mode = #tpu.pipeline_mode<synchronous>, transform_indices = @transform_7, window_bounds = array<i64: 1, 32>}]} {
    %c0 = arith.constant 0 : index
    %c0_0 = arith.constant 0 : index
    %0 = vector.load %arg5[%c0, %c0_0] : memref<1x32xf32, #tpu.memory_space<vmem>>, vector<1x32xf32>
    %c0_1 = arith.constant 0 : index
    %c0_2 = arith.constant 0 : index
    %1 = vector.load %arg6[%c0_1, %c0_2] : memref<1x32xf32, #tpu.memory_space<vmem>>, vector<1x32xf32>
    %c0_i32 = arith.constant 0 : i32
    %2 = arith.cmpi eq, %arg0, %c0_i32 : i32
    %3 = arith.extui %2 : i1 to i32
    %c0_i32_3 = arith.constant 0 : i32
    %4 = arith.cmpi ne, %3, %c0_i32_3 : i32
    scf.if %4 {
      %c0_36 = arith.constant 0 : index
      %c0_37 = arith.constant 0 : index
      %67 = vector.load %arg1[%c0_36, %c0_37] : memref<1x64xf32, #tpu.memory_space<vmem>>, vector<1x64xf32>
      %c0_38 = arith.constant 0 : index
      %c0_39 = arith.constant 0 : index
      %68 = vector.load %arg3[%c0_38, %c0_39] : memref<32x64xf32, #tpu.memory_space<vmem>>, vector<32x64xf32>
      %cst_40 = arith.constant dense<0.000000e+00> : vector<1x32xf32>
      %69 = tpu.matmul %67, %68, %cst_40 {dimension_numbers = #tpu.dot_dimension_numbers<[1], [1], [0], [0], [0, 0, 1, 0], [], []>} : vector<1x64xf32>, vector<32x64xf32>, vector<1x32xf32> -> vector<1x32xf32>
      %cst_41 = arith.constant dense<0.000000e+00> : vector<1xf32>
      %70 = vector.multi_reduction <add>, %69, %cst_41 [1] : vector<1x32xf32> to vector<1xf32>
      %71 = vector.shape_cast %70 : vector<1xf32> to vector<1x1xf32>
      %cst_42 = arith.constant 3.200000e+01 : f32
      %72 = vector.broadcast %cst_42 : f32 to vector<1x1xf32>
      %73 = arith.divf %71, %72 : vector<1x1xf32>
      %74 = vector.broadcast %73 : vector<1x1xf32> to vector<1x32xf32>
      %75 = arith.subf %69, %74 : vector<1x32xf32>
      %76 = arith.mulf %75, %75 : vector<1x32xf32>
      %cst_43 = arith.constant dense<0.000000e+00> : vector<1xf32>
      %77 = vector.multi_reduction <add>, %76, %cst_43 [1] : vector<1x32xf32> to vector<1xf32>
      %78 = vector.shape_cast %77 : vector<1xf32> to vector<1x1xf32>
      %cst_44 = arith.constant 3.200000e+01 : f32
      %79 = vector.broadcast %cst_44 : f32 to vector<1x1xf32>
      %80 = arith.divf %78, %79 : vector<1x1xf32>
      %cst_45 = arith.constant 9.99999974E-6 : f32
      %81 = vector.broadcast %cst_45 : f32 to vector<1x1xf32>
      %82 = arith.addf %80, %81 : vector<1x1xf32>
      %83 = math.rsqrt %82 : vector<1x1xf32>
      %84 = vector.broadcast %83 : vector<1x1xf32> to vector<1x32xf32>
      %85 = arith.mulf %75, %84 : vector<1x32xf32>
      %86 = arith.mulf %85, %0 : vector<1x32xf32>
      %87 = arith.addf %86, %1 : vector<1x32xf32>
      %cst_46 = arith.constant 0.176776692 : f32
      %88 = vector.broadcast %cst_46 : f32 to vector<1x32xf32>
      %89 = arith.mulf %87, %88 : vector<1x32xf32>
      %c0_47 = arith.constant 0 : index
      %c0_48 = arith.constant 0 : index
      %90 = vector.load %arg9[%c0_47, %c0_48] : memref<1x32xf32, #tpu.memory_space<vmem>>, vector<1x32xf32>
      tpu.vector_store %arg9[%c0_47, %c0_48], %89 {strides = array<i32>} : memref<1x32xf32, #tpu.memory_space<vmem>>, vector<1x32xf32>,
      %cst_49 = arith.constant -1.000000e+30 : f32
      %91 = vector.broadcast %cst_49 : f32 to vector<1x1xf32>
      %c0_50 = arith.constant 0 : index
      %c0_51 = arith.constant 0 : index
      %92 = vector.load %arg10[%c0_50, %c0_51] : memref<1x1xf32, #tpu.memory_space<vmem>>, vector<1x1xf32>
      tpu.vector_store %arg10[%c0_50, %c0_51], %91 {strides = array<i32>} : memref<1x1xf32, #tpu.memory_space<vmem>>, vector<1x1xf32>,
      %cst_52 = arith.constant 0.000000e+00 : f32
      %93 = vector.broadcast %cst_52 : f32 to vector<1x1xf32>
      %c0_53 = arith.constant 0 : index
      %c0_54 = arith.constant 0 : index
      %94 = vector.load %arg11[%c0_53, %c0_54] : memref<1x1xf32, #tpu.memory_space<vmem>>, vector<1x1xf32>
      tpu.vector_store %arg11[%c0_53, %c0_54], %93 {strides = array<i32>} : memref<1x1xf32, #tpu.memory_space<vmem>>, vector<1x1xf32>,
      %cst_55 = arith.constant 0.000000e+00 : f32
      %95 = vector.broadcast %cst_55 : f32 to vector<1x32xf32>
      %c0_56 = arith.constant 0 : index
      %c0_57 = arith.constant 0 : index
      %96 = vector.load %arg12[%c0_56, %c0_57] : memref<1x32xf32, #tpu.memory_space<vmem>>, vector<1x32xf32>
      tpu.vector_store %arg12[%c0_56, %c0_57], %95 {strides = array<i32>} : memref<1x32xf32, #tpu.memory_space<vmem>>, vector<1x32xf32>,
    } else {
    }
    %c0_4 = arith.constant 0 : index
    %c0_5 = arith.constant 0 : index
    %5 = vector.load %arg2[%c0_4, %c0_5] : memref<128x64xf32, #tpu.memory_space<vmem>>, vector<128x64xf32>
    %c0_6 = arith.constant 0 : index
    %c0_7 = arith.constant 0 : index
    %6 = vector.load %arg4[%c0_6, %c0_7] : memref<32x64xf32, #tpu.memory_space<vmem>>, vector<32x64xf32>
    %cst = arith.constant dense<0.000000e+00> : vector<128x32xf32>
    %7 = tpu.matmul %5, %6, %cst {dimension_numbers = #tpu.dot_dimension_numbers<[1], [1], [0], [0], [0, 0, 1, 0], [], []>} : vector<128x64xf32>, vector<32x64xf32>, vector<128x32xf32> -> vector<128x32xf32>
    %cst_8 = arith.constant dense<0.000000e+00> : vector<128xf32>
    %8 = vector.multi_reduction <add>, %7, %cst_8 [1] : vector<128x32xf32> to vector<128xf32>
    %9 = vector.shape_cast %8 : vector<128xf32> to vector<128x1xf32>
    %cst_9 = arith.constant 3.200000e+01 : f32
    %10 = vector.broadcast %cst_9 : f32 to vector<128x1xf32>
    %11 = arith.divf %9, %10 : vector<128x1xf32>
    %12 = vector.broadcast %11 : vector<128x1xf32> to vector<128x32xf32>
    %13 = arith.subf %7, %12 : vector<128x32xf32>
    %14 = arith.mulf %13, %13 : vector<128x32xf32>
    %cst_10 = arith.constant dense<0.000000e+00> : vector<128xf32>
    %15 = vector.multi_reduction <add>, %14, %cst_10 [1] : vector<128x32xf32> to vector<128xf32>
    %16 = vector.shape_cast %15 : vector<128xf32> to vector<128x1xf32>
    %cst_11 = arith.constant 3.200000e+01 : f32
    %17 = vector.broadcast %cst_11 : f32 to vector<128x1xf32>
    %18 = arith.divf %16, %17 : vector<128x1xf32>
    %cst_12 = arith.constant 9.99999974E-6 : f32
    %19 = vector.broadcast %cst_12 : f32 to vector<128x1xf32>
    %20 = arith.addf %18, %19 : vector<128x1xf32>
    %21 = math.rsqrt %20 : vector<128x1xf32>
    %22 = vector.broadcast %21 : vector<128x1xf32> to vector<128x32xf32>
    %23 = arith.mulf %13, %22 : vector<128x32xf32>
    %24 = vector.broadcast %0 : vector<1x32xf32> to vector<128x32xf32>
    %25 = arith.mulf %23, %24 : vector<128x32xf32>
    %26 = vector.broadcast %1 : vector<1x32xf32> to vector<128x32xf32>
    %27 = arith.addf %25, %26 : vector<128x32xf32>
    %c0_13 = arith.constant 0 : index
    %c0_14 = arith.constant 0 : index
    %28 = vector.load %arg9[%c0_13, %c0_14] : memref<1x32xf32, #tpu.memory_space<vmem>>, vector<1x32xf32>
    %cst_15 = arith.constant dense<0.000000e+00> : vector<1x128xf32>
    %29 = tpu.matmul %28, %27, %cst_15 {dimension_numbers = #tpu.dot_dimension_numbers<[1], [1], [0], [0], [0, 0, 1, 0], [], []>} : vector<1x32xf32>, vector<128x32xf32>, vector<1x128xf32> -> vector<1x128xf32>
    %c128_i32 = arith.constant 128 : i32
    %30 = arith.muli %arg0, %c128_i32 : i32
    %31 = tpu.iota {dimensions = array<i32: 1>} : vector<1x128xi32>
    %32 = vector.broadcast %30 : i32 to vector<1x128xi32>
    %33 = arith.addi %32, %31 : vector<1x128xi32>
    %c8_i32 = arith.constant 8 : i32
    %34 = vector.broadcast %c8_i32 : i32 to vector<1x128xi32>
    %35 = arith.cmpi slt, %33, %34 : vector<1x128xi32>
    %cst_16 = arith.constant -1.000000e+30 : f32
    %36 = vector.broadcast %cst_16 : f32 to vector<1x128xf32>
    %37 = arith.select %35, %29, %36 : vector<1x128xi1>, vector<1x128xf32>
    %c128_i32_17 = arith.constant 128 : i32
    %38 = arith.muli %arg0, %c128_i32_17 : i32
    %39 = tpu.assume_multiple %38, 128 : i32
    %c0_18 = arith.constant 0 : index
    %40 = arith.index_cast %39 : i32 to index
    %41 = vector.load %arg7[%c0_18, %40] : memref<1x128xf32, #tpu.memory_space<vmem>>, vector<1x128xf32>
    tpu.vector_store %arg7[%c0_18, %40], %37 {strides = array<i32>} : memref<1x128xf32, #tpu.memory_space<vmem>>, vector<1x128xf32>,
    %c0_19 = arith.constant 0 : index
    %c0_20 = arith.constant 0 : index
    %42 = vector.load %arg10[%c0_19, %c0_20] : memref<1x1xf32, #tpu.memory_space<vmem>>, vector<1x1xf32>
    %cst_21 = arith.constant dense<0xFF800000> : vector<1xf32>
    %43 = vector.multi_reduction <maximumf>, %37, %cst_21 [1] : vector<1x128xf32> to vector<1xf32>
    %44 = vector.shape_cast %43 : vector<1xf32> to vector<1x1xf32>
    %45 = arith.maximumf %42, %44 : vector<1x1xf32>
    %46 = arith.subf %42, %45 : vector<1x1xf32>
    %47 = math.exp %46 : vector<1x1xf32>
    %48 = vector.broadcast %45 : vector<1x1xf32> to vector<1x128xf32>
    %49 = arith.subf %37, %48 : vector<1x128xf32>
    %50 = math.exp %49 : vector<1x128xf32>
    %c0_22 = arith.constant 0 : index
    %c0_23 = arith.constant 0 : index
    %51 = vector.load %arg11[%c0_22, %c0_23] : memref<1x1xf32, #tpu.memory_space<vmem>>, vector<1x1xf32>
    %52 = arith.mulf %47, %51 : vector<1x1xf32>
    %cst_24 = arith.constant dense<0.000000e+00> : vector<1xf32>
    %53 = vector.multi_reduction <add>, %50, %cst_24 [1] : vector<1x128xf32> to vector<1xf32>
    %54 = vector.shape_cast %53 : vector<1xf32> to vector<1x1xf32>
    %55 = arith.addf %52, %54 : vector<1x1xf32>
    %c0_25 = arith.constant 0 : index
    %c0_26 = arith.constant 0 : index
    %56 = vector.load %arg11[%c0_25, %c0_26] : memref<1x1xf32, #tpu.memory_space<vmem>>, vector<1x1xf32>
    tpu.vector_store %arg11[%c0_25, %c0_26], %55 {strides = array<i32>} : memref<1x1xf32, #tpu.memory_space<vmem>>, vector<1x1xf32>,
    %c0_27 = arith.constant 0 : index
    %c0_28 = arith.constant 0 : index
    %57 = vector.load %arg12[%c0_27, %c0_28] : memref<1x32xf32, #tpu.memory_space<vmem>>, vector<1x32xf32>
    %58 = vector.broadcast %47 : vector<1x1xf32> to vector<1x32xf32>
    %59 = arith.mulf %58, %57 : vector<1x32xf32>
    %cst_29 = arith.constant dense<0.000000e+00> : vector<1x32xf32>
    %60 = tpu.matmul %50, %27, %cst_29 {dimension_numbers = #tpu.dot_dimension_numbers<[1], [0], [0], [1], [0, 0, 1, 1], [], []>} : vector<1x128xf32>, vector<128x32xf32>, vector<1x32xf32> -> vector<1x32xf32>
    %61 = arith.addf %59, %60 : vector<1x32xf32>
    %c0_30 = arith.constant 0 : index
    %c0_31 = arith.constant 0 : index
    %62 = vector.load %arg12[%c0_30, %c0_31] : memref<1x32xf32, #tpu.memory_space<vmem>>, vector<1x32xf32>
    tpu.vector_store %arg12[%c0_30, %c0_31], %61 {strides = array<i32>} : memref<1x32xf32, #tpu.memory_space<vmem>>, vector<1x32xf32>,
    %c0_32 = arith.constant 0 : index
    %c0_33 = arith.constant 0 : index
    %63 = vector.load %arg10[%c0_32, %c0_33] : memref<1x1xf32, #tpu.memory_space<vmem>>, vector<1x1xf32>
    tpu.vector_store %arg10[%c0_32, %c0_33], %45 {strides = array<i32>} : memref<1x1xf32, #tpu.memory_space<vmem>>, vector<1x1xf32>,
    %c0_i32_34 = arith.constant 0 : i32
    %64 = arith.cmpi eq, %arg0, %c0_i32_34 : i32
    %65 = arith.extui %64 : i1 to i32
    %c0_i32_35 = arith.constant 0 : i32
    %66 = arith.cmpi ne, %65, %c0_i32_35 : i32
    scf.if %66 {
      %c0_36 = arith.constant 0 : index
      %c0_37 = arith.constant 0 : index
      %67 = vector.load %arg11[%c0_36, %c0_37] : memref<1x1xf32, #tpu.memory_space<vmem>>, vector<1x1xf32>
      %68 = tpu.reciprocal %67 {approx = true} : vector<1x1xf32> -> vector<1x1xf32>
      %c0_38 = arith.constant 0 : index
      %c0_39 = arith.constant 0 : index
      %69 = vector.load %arg7[%c0_38, %c0_39] : memref<1x128xf32, #tpu.memory_space<vmem>>, vector<1x128xf32>
      %c0_40 = arith.constant 0 : index
      %c0_41 = arith.constant 0 : index
      %70 = vector.load %arg10[%c0_40, %c0_41] : memref<1x1xf32, #tpu.memory_space<vmem>>, vector<1x1xf32>
      %71 = vector.broadcast %70 : vector<1x1xf32> to vector<1x128xf32>
      %72 = arith.subf %69, %71 : vector<1x128xf32>
      %73 = math.exp %72 : vector<1x128xf32>
      %74 = vector.broadcast %68 : vector<1x1xf32> to vector<1x128xf32>
      %75 = arith.mulf %73, %74 : vector<1x128xf32>
      %c0_42 = arith.constant 0 : index
      %c0_43 = arith.constant 0 : index
      %76 = vector.load %arg7[%c0_42, %c0_43] : memref<1x128xf32, #tpu.memory_space<vmem>>, vector<1x128xf32>
      tpu.vector_store %arg7[%c0_42, %c0_43], %75 {strides = array<i32>} : memref<1x128xf32, #tpu.memory_space<vmem>>, vector<1x128xf32>,
      %c0_44 = arith.constant 0 : index
      %c0_45 = arith.constant 0 : index
      %77 = vector.load %arg12[%c0_44, %c0_45] : memref<1x32xf32, #tpu.memory_space<vmem>>, vector<1x32xf32>
      %78 = vector.broadcast %68 : vector<1x1xf32> to vector<1x32xf32>
      %79 = arith.mulf %77, %78 : vector<1x32xf32>
      %c0_46 = arith.constant 0 : index
      %c0_47 = arith.constant 0 : index
      %80 = vector.load %arg8[%c0_46, %c0_47] : memref<1x32xf32, #tpu.memory_space<vmem>>, vector<1x32xf32>
      tpu.vector_store %arg8[%c0_46, %c0_47], %79 {strides = array<i32>} : memref<1x32xf32, #tpu.memory_space<vmem>>, vector<1x32xf32>,
    } else {
    }
    return
  }
  func.func @transform_0(%arg0: i32) -> (i32, i32) {
    %c0_i32 = arith.constant 0 : i32
    %c0_i32_0 = arith.constant 0 : i32
    %c0_i32_1 = arith.constant 0 : i32
    return %c0_i32, %c0_i32_0 : i32, i32
  }
  func.func @transform_1(%arg0: i32) -> (i32, i32) {
    %c0_i32 = arith.constant 0 : i32
    %c0_i32_0 = arith.constant 0 : i32
    return %arg0, %c0_i32 : i32, i32
  }
  func.func @transform_2(%arg0: i32) -> (i32, i32) {
    %c0_i32 = arith.constant 0 : i32
    %c0_i32_0 = arith.constant 0 : i32
    %c0_i32_1 = arith.constant 0 : i32
    return %c0_i32, %c0_i32_0 : i32, i32
  }
  func.func @transform_3(%arg0: i32) -> (i32, i32) {
    %c0_i32 = arith.constant 0 : i32
    %c0_i32_0 = arith.constant 0 : i32
    %c0_i32_1 = arith.constant 0 : i32
    return %c0_i32, %c0_i32_0 : i32, i32
  }
  func.func @transform_4(%arg0: i32) -> (i32, i32) {
    %c0_i32 = arith.constant 0 : i32
    %c0_i32_0 = arith.constant 0 : i32
    %c0_i32_1 = arith.constant 0 : i32
    return %c0_i32, %c0_i32_0 : i32, i32
  }
  func.func @transform_5(%arg0: i32) -> (i32, i32) {
    %c0_i32 = arith.constant 0 : i32
    %c0_i32_0 = arith.constant 0 : i32
    %c0_i32_1 = arith.constant 0 : i32
    return %c0_i32, %c0_i32_0 : i32, i32
  }
  func.func @transform_6(%arg0: i32) -> (i32, i32) {
    %c0_i32 = arith.constant 0 : i32
    %c0_i32_0 = arith.constant 0 : i32
    %c0_i32_1 = arith.constant 0 : i32
    return %c0_i32, %c0_i32_0 : i32, i32
  }
  func.func @transform_7(%arg0: i32) -> (i32, i32) {
    %c0_i32 = arith.constant 0 : i32
    %c0_i32_0 = arith.constant 0 : i32
    %c0_i32_1 = arith.constant 0 : i32
    return %c0_i32, %c0_i32_0 : i32, i32
  }
}

</mosaic_0001>

<bundles_post_ra>
// kernel: tpu_custom_call.1
= control target key start
LH: loop header
LB: loop body
LE: loop exit
PB: predicated region body
PF: predicated region fallthrough
CT: control target
= control target key end

     0   :  { %13 = vsyncpa [#allocation7], 0  ;;  %vm38_vm0 = vcmask 523264   ;;  %s1702_s0 = inlined_call_operand.vmem [shape: f32[1,64], index: 0, kind: input, shape index: {}]   ;;  %s1703_s1 = inlined_call_operand.vmem [shape: f32[128,64], index: 1, kind: input, shape index: {}]   ;;  %s1704_s2 = inlined_call_operand.vmem [shape: f32[32,64], index: 2, kind: input, shape index: {}]   ;;  %s1705_s3 = inlined_call_operand.vmem [shape: f32[32,64], index: 3, kind: input, shape index: {}]   ;;  %s1706_s4 = inlined_call_operand.vmem [shape: f32[1,32], index: 4, kind: input, shape index: {}]   ;;  %s1707_s5 = inlined_call_operand.vmem [shape: f32[1,32], index: 5, kind: input, shape index: {}]   ;;  %s1708_s6 = inlined_call_operand.hbm [shape: f32[1,128], index: 6, kind: output, shape index: {0}]   ;;  %s1709_s7 = inlined_call_operand.hbm [shape: f32[1,32], index: 7, kind: output, shape index: {1}]  }
   0x1   :  { %v131_v0 = vld [vmem:[%s1705_s3 + $0x18] sm:$0xff]  ;;  %v130_v2 = vld [vmem:[%s1705_s3 + $0x10] sm:$0xff] }
   0x2   :  { %899 = vmatpush.xpose.msk.msra.mxu1 %vm38_vm0, %v131_v0  ;;  %900 = vmatpush.xpose.msk.msra.mxu3 %vm38_vm0, %v131_v0  ;;  %v37_v1 = vld [vmem:[%s1704_s2 + $0x18] sm:$0xff]  ;;  %v36_v3 = vld [vmem:[%s1704_s2 + $0x10] sm:$0xff] }
   0x3   :  { %857 = vmatpush.xpose.msk.msra.mxu0 %vm38_vm0, %v37_v1 }
   0x6   :  { %901 = vmatpush.xpose.msk.msra.mxu1 %vm38_vm0, %v130_v2  ;;  %902 = vmatpush.xpose.msk.msra.mxu3 %vm38_vm0, %v130_v2 }
   0x7   :  { %14 = vsyncpa [#allocation9], 0  ;;  %v129_v4 = vld [vmem:[%s1705_s3 + $0x8] sm:$0xff]  ;;  %858 = vmatpush.xpose.msk.msra.mxu0 %vm38_vm0, %v36_v3  ;;  %v128_v6 = vld [vmem:[%s1705_s3] sm:$0xff]  ;;  %vm258_vm1 = vcmask 261120   ;;  %vm74_vm2 = vcmask 253952  }
   0x8   :  { %v35_v5 = vld [vmem:[%s1704_s2 + $0x8] sm:$0xff]  ;;  %v34_v7 = vld [vmem:[%s1704_s2] sm:$0xff]  ;;  %v118_v11 = vld [vmem:[%s1703_s1 + $0x30] sm:$0xff]  ;;  %v1014_v37 = vmov 0.0   ;;  %v1015_v58 = vmov 32.0   ;;  %s831_s8 = sshll.u32 %s1708_s6, 4  ;;  %s832_s8 = int_to_ptr.hbm [resolvable:$true] %s831_s8 }
   0x9   :  { %v117_v8 = vld [vmem:[%s1703_s1 + $0x28] sm:$0xff]  ;;  %v124_v9 = vld [vmem:[%s1703_s1 + $0x60] sm:$0xff]  ;;  %v119_v14 = vld [vmem:[%s1703_s1 + $0x38] sm:$0xff]  ;;  %111 = vst.msk [vmem:[#allocation5] sm:$0x1] %vm74_vm2, %v1014_v37  ;;  %918 = vrcp.f32 %v1015_v58  ;;  %s1019_s9 = smov [#allocation8]  }
   0xa   :  { %903 = vmatpush.xpose.msk.msra.mxu1 %vm38_vm0, %v129_v4  ;;  %904 = vmatpush.xpose.msk.msra.mxu3 %vm38_vm0, %v129_v4  ;;  %v33_v10 = vld [vmem:[%s1702_s0] sm:$0x1]  ;;  %v125_v12 = vld [vmem:[%s1703_s1 + $0x68] sm:$0xff]  ;;  %v126_v15 = vld [vmem:[%s1703_s1 + $0x70] sm:$0xff]  ;;  %s840_s10 = sshll.u32 %s1019_s9, 4  ;;  %s842_s13 = sshll.u32 %s1709_s7, 4  ;;  %s841_s10 = int_to_ptr.vmem [resolvable:$true] %s840_s10  ;;  %s843_s13 = int_to_ptr.hbm [resolvable:$true] %s842_s13 }
   0xb   :  { %859 = vmatpush.xpose.msk.msra.mxu0 %vm38_vm0, %v35_v5  ;;  %v112_v13 = vld [vmem:[%s1703_s1] sm:$0xff]  ;;  %v113_v16 = vld [vmem:[%s1703_s1 + $0x8] sm:$0xff]  ;;  %v127_v18 = vld [vmem:[%s1703_s1 + $0x78] sm:$0xff] }
   0xc   :  { %v120_v17 = vld [vmem:[%s1703_s1 + $0x40] sm:$0xff]  ;;  %v114_v19 = vld [vmem:[%s1703_s1 + $0x10] sm:$0xff]  ;;  %v121_v20 = vld [vmem:[%s1703_s1 + $0x48] sm:$0xff] }
   0xd   :  { %v115_v21 = vld [vmem:[%s1703_s1 + $0x18] sm:$0xff]  ;;  %v122_v22 = vld [vmem:[%s1703_s1 + $0x50] sm:$0xff]  ;;  %v116_v23 = vld [vmem:[%s1703_s1 + $0x20] sm:$0xff] }
   0xe   :  { %905 = vmatpush.xpose.msk.msra.mxu1 %vm38_vm0, %v128_v6  ;;  %906 = vmatpush.xpose.msk.msra.mxu3 %vm38_vm0, %v128_v6  ;;  %v123_v24 = vld [vmem:[%s1703_s1 + $0x58] sm:$0xff] }
   0xf   :  { %860 = vmatpush.xpose.msk.msra.mxu0 %vm38_vm0, %v34_v7  ;;  %v919_v59 = vpop.eup %918 }
  0x10   :  { %v79_v60 = vmul.f32 32.0, %v919_v59  ;;  %vm83_vm3 = vweird.f32 %v919_v59 }
  0x11   :  { %871 = vmatmul.msk.f32.vlgmr.msra.gmra.mxu1 %vm38_vm0, %v117_v8  ;;  %878 = vmatmul.msk.f32.vlgmr.msra.gmra.mxu3 %vm38_vm0, %v124_v9 }
  0x12   :  { %861 = vmatmul.msk.f32.vlgmr.msra.gmra.mxu0 %vm38_vm0, %v33_v10  ;;  %v80_v61 = vsub.f32 1.0, %v79_v60 }
  0x13   :  { %862 = vmatpush.xpose.msk.msrb.mxu0 %vm38_vm0, %v131_v0 }
  0x14   :  { %v81_v62 = vmul.f32 %v919_v59, %v80_v61 }
  0x16   :  { %v82_v0 = vadd.f32 %v919_v59, %v81_v62 }
  0x17   :  { %863 = vmatpush.xpose.msk.msrb.mxu0 %vm38_vm0, %v130_v2 }
  0x18   :  { %v1225_v1 = vsel %vm83_vm3, %v919_v59, %v82_v0 }
  0x19   :  { %872 = vmatmul.msk.f32.gmra.mxu1 %vm38_vm0, %v118_v11  ;;  %879 = vmatmul.msk.f32.gmra.mxu3 %vm38_vm0, %v125_v12 }
  0x1b   :  { %864 = vmatpush.xpose.msk.msrb.mxu0 %vm38_vm0, %v129_v4 }
  0x1f   :  { %865 = vmatpush.xpose.msk.msrb.mxu0 %vm38_vm0, %v128_v6 }
  0x21   :  { %873 = vmatmul.msk.f32.gmra.mxu1 %vm38_vm0, %v119_v14  ;;  %880 = vmatmul.msk.f32.gmra.mxu3 %vm38_vm0, %v126_v15 }
  0x22   :  { %866 = vmatmul.msk.f32.vlgmr.msrb.gmra.mxu0 %vm38_vm0, %v112_v13 }
  0x29   :  { %874 = vmatmul.msk.f32.gmra.mxu1 %vm38_vm0, %v120_v17  ;;  %881 = vmatmul.msk.f32.gmra.mxu3 %vm38_vm0, %v127_v18 }
  0x2a   :  { %867 = vmatmul.msk.f32.gmra.mxu0 %vm38_vm0, %v113_v16 }
  0x31   :  { %875 = vmatmul.msk.f32.gmra.mxu1 %vm38_vm0, %v121_v20 }
  0x32   :  { %868 = vmatmul.msk.f32.gmra.mxu0 %vm38_vm0, %v114_v19 }
  0x39   :  { %876 = vmatmul.msk.f32.gmra.mxu1 %vm38_vm0, %v122_v22 }
  0x3a   :  { %869 = vmatmul.msk.f32.gmra.mxu0 %vm38_vm0, %v115_v21 }
  0x41   :  { %877 = vmatmul.msk.f32.gmra.mxu1 %vm38_vm0, %v123_v24 }
  0x42   :  { %870 = vmatmul.msk.f32.gmra.mxu0 %vm38_vm0, %v116_v23 }
  0x8e   :  { %v1168_v25 = vpop.f32.mrf.mxu1 }
  0x8f   :  { %v1170_v26 = vpop.f32.mrf.mxu0  ;;  %v274_v43 = vsel %vm258_vm1, %v1168_v25, 0.0 }
  0x90   :  { %v75_v52 = vsel %vm74_vm2, %v1170_v26, 0.0 }
  0x94   :  { %v246_v27 = vpop.f32.mrf.mxu3 }
  0x95   :  { %v295_v35 = vsel %vm258_vm1, %v246_v27, 0.0 }
  0x96   :  { %v1172_v28 = vpop.f32.mrf.mxu1 }
  0x97   :  { %v277_v51 = vsel %vm258_vm1, %v1172_v28, 0.0 }
  0x9c   :  { %v1174_v29 = vpop.f32.mrf.mxu3 }
  0x9d   :  { %v298_v31 = vsel %vm258_vm1, %v1174_v29, 0.0 }
  0x9e   :  { %299 = vadd.xlane.f32.xlu1 %v298_v31  ;;  %v1180_v32 = vpop.f32.mrf.mxu1 }
  0x9f   :  { %v1176_v30 = vpop.f32.mrf.mxu0  ;;  %v280_v55 = vsel %vm258_vm1, %v1180_v32, 0.0 }
  0xa4   :  { %v1182_v33 = vpop.f32.mrf.mxu3 }
  0xa5   :  { %v301_v44 = vsel %vm258_vm1, %v1182_v33, 0.0 }
  0xa6   :  { %296 = vadd.xlane.f32.xlu1 %v295_v35  ;;  %v1187_v36 = vpop.f32.mrf.mxu1 }
  0xa7   :  { %v1184_v34 = vpop.f32.mrf.mxu0  ;;  %v283_v38 = vsel %vm258_vm1, %v1187_v36, 0.0 }
  0xa8   :  { %v262_v19 = vsel %vm258_vm1, %v1184_v34, 0.0 }
  0xac   :  { %v255_v39 = vpop.f32.mrf.mxu3 }
  0xad   :  { %v304_v40 = vsel %vm258_vm1, %v255_v39, 0.0 }
  0xae   :  { %305 = vadd.xlane.f32.xlu0 %v304_v40  ;;  %284 = vadd.xlane.f32.xlu1 %v283_v38  ;;  %v1194_v41 = vpop.f32.mrf.mxu1 }
  0xaf   :  { %v1196_v42 = vpop.f32.mrf.mxu0  ;;  %v286_v47 = vsel %vm258_vm1, %v1194_v41, 0.0 }
  0xb0   :  { %v265_v54 = vsel %vm258_vm1, %v1196_v42, 0.0 }
  0xb6   :  { %302 = vadd.xlane.f32.xlu0 %v301_v44  ;;  %275 = vadd.xlane.f32.xlu1 %v274_v43  ;;  %v1202_v45 = vpop.f32.mrf.mxu1 }
  0xb7   :  { %v1204_v46 = vpop.f32.mrf.mxu0  ;;  %v289_v53 = vsel %vm258_vm1, %v1202_v45, 0.0 }
  0xb8   :  { %v268_v48 = vsel %vm258_vm1, %v1204_v46, 0.0 }
  0xbe   :  { %287 = vadd.xlane.f32.xlu0 %v286_v47  ;;  %v243_v49 = vpop.f32.mrf.mxu1  ;;  %269 = vadd.xlane.f32.xlu1 %v268_v48 }
  0xbf   :  { %v292_v50 = vsel %vm258_vm1, %v243_v49, 0.0  ;;  %v1221_v56 = vpop.f32.mrf.mxu0 }
  0xc0   :  { %293 = vadd.xlane.f32.xlu2 %v292_v50  ;;  %v271_v57 = vsel %vm258_vm1, %v1221_v56, 0.0 }
  0xc6   :  { %278 = vadd.xlane.f32.xlu0 %v277_v51  ;;  %76 = vadd.xlane.f32.xlu1 %v75_v52 }
  0xc8   :  { %290 = vadd.xlane.f32.xlu2 %v289_v53 }
  0xce   :  { %266 = vadd.xlane.f32.xlu0 %v265_v54 }
  0xd0   :  { %281 = vadd.xlane.f32.xlu2 %v280_v55 }
  0xd8   :  { %272 = vadd.xlane.f32.xlu2 %v271_v57 }
 0x111   :  { %v300_v63 = vpop.xlane.xlu1 %299 }
 0x112   :  { %v327_v14 = vmul.f32 %v300_v63, %v1225_v1 }
 0x114   :  { %v1247_v18 = vsub.f32 %v1174_v29, %v327_v14 }
 0x116   :  { %v359_v24 = vmul.f32 %v1247_v18, %v1247_v18 }
 0x119   :  { %v297_v2 = vpop.xlane.xlu1 %296 }
 0x11a   :  { %v326_v3 = vmul.f32 %v297_v2, %v1225_v1 }
 0x11c   :  { %v1228_v4 = vsub.f32 %v246_v27, %v326_v3 }
 0x11e   :  { %v358_v5 = vmul.f32 %v1228_v4, %v1228_v4 }
 0x120   :  { %v398_v6 = vsel %vm258_vm1, %v358_v5, 0.0 }
 0x121   :  { %v306_v7 = vpop.xlane.xlu0 %305  ;;  %399 = vadd.xlane.f32.xlu1 %v398_v6  ;;  %v285_v16 = vpop.xlane.xlu1 %284 }
 0x122   :  { %v329_v8 = vmul.f32 %v306_v7, %v1225_v1  ;;  %v322_v27 = vmul.f32 %v285_v16, %v1225_v1 }
 0x124   :  { %v1234_v9 = vsub.f32 %v255_v39, %v329_v8  ;;  %v1262_v39 = vsub.f32 %v1187_v36, %v322_v27  ;;  %v259_v36 = vsel %vm258_vm1, %v1176_v30, 0.0 }
 0x126   :  { %v361_v10 = vmul.f32 %v1234_v9, %v1234_v9  ;;  %v354_v50 = vmul.f32 %v1262_v39, %v1262_v39 }
 0x128   :  { %v407_v11 = vsel %vm258_vm1, %v361_v10, 0.0 }
 0x129   :  { %v303_v12 = vpop.xlane.xlu0 %302  ;;  %408 = vadd.xlane.f32.xlu0 %v407_v11  ;;  %v276_v29 = vpop.xlane.xlu1 %275 }
 0x12a   :  { %v328_v13 = vmul.f32 %v303_v12, %v1225_v1  ;;  %v319_v48 = vmul.f32 %v276_v29, %v1225_v1 }
 0x12c   :  { %v1242_v15 = vsub.f32 %v1182_v33, %v328_v13  ;;  %v401_v33 = vsel %vm258_vm1, %v359_v24, 0.0  ;;  %v1281_v54 = vsub.f32 %v1168_v25, %v319_v48 }
 0x12e   :  { %v360_v17 = vmul.f32 %v1242_v15, %v1242_v15  ;;  %v351_v62 = vmul.f32 %v1281_v54, %v1281_v54 }
 0x130   :  { %v404_v20 = vsel %vm258_vm1, %v360_v17, 0.0  ;;  %v377_v5 = vsel %vm258_vm1, %v351_v62, 0.0 }
 0x131   :  { %v288_v21 = vpop.xlane.xlu0 %287  ;;  %263 = vadd.xlane.f32.xlu0 %v262_v19  ;;  %405 = vadd.xlane.f32.xlu2 %v404_v20  ;;  %v270_v53 = vpop.xlane.xlu1 %269 }
 0x132   :  { %v323_v44 = vmul.f32 %v288_v21, %v1225_v1 }
 0x133   :  { %v294_v22 = vpop.xlane.xlu2 %293 }
 0x134   :  { %v325_v23 = vmul.f32 %v294_v22, %v1225_v1  ;;  %v1274_v51 = vsub.f32 %v1194_v41, %v323_v44 }
 0x136   :  { %v1256_v31 = vsub.f32 %v243_v49, %v325_v23  ;;  %v355_v60 = vmul.f32 %v1274_v51, %v1274_v51 }
 0x138   :  { %v357_v35 = vmul.f32 %v1256_v31, %v1256_v31  ;;  %v389_v0 = vsel %vm258_vm1, %v355_v60, 0.0 }
 0x139   :  { %v279_v38 = vpop.xlane.xlu0 %278  ;;  %402 = vadd.xlane.f32.xlu2 %v401_v33  ;;  %v77_v6 = vpop.xlane.xlu1 %76 }
 0x13a   :  { %v395_v40 = vsel %vm258_vm1, %v357_v35, 0.0  ;;  %v320_v41 = vmul.f32 %v279_v38, %v1225_v1  ;;  %v85_v11 = vmul.f32 %v1225_v1, %v77_v6 }
 0x13b   :  { %v291_v43 = vpop.xlane.xlu2 %290  ;;  %396 = vadd.xlane.f32.xlu0 %v395_v40 }
 0x13c   :  { %v324_v47 = vmul.f32 %v291_v43, %v1225_v1  ;;  %v1296_v63 = vsub.f32 %v1172_v28, %v320_v41  ;;  %v317_v28 = vmul.f32 %v270_v53, %v1225_v1  ;;  %v1323_v17 = vsub.f32 %v1170_v26, %v85_v11  ;;  %v1359_v11 = vld [vmem:[%s1706_s4] ss:$0 sm:$0xff] }
 0x13e   :  { %v1269_v49 = vsub.f32 %v1202_v45, %v324_v47  ;;  %v386_v45 = vsel %vm258_vm1, %v354_v50, 0.0  ;;  %v352_v10 = vmul.f32 %v1296_v63, %v1296_v63  ;;  %v1317_v13 = vsub.f32 %v1204_v46, %v317_v28 }
 0x13f   :  { %v87_v46 = vmul.f32 %v1323_v17, %v1323_v17 }
 0x140   :  { %v356_v52 = vmul.f32 %v1269_v49, %v1269_v49  ;;  %v380_v14 = vsel %vm258_vm1, %v352_v10, 0.0  ;;  %v349_v20 = vmul.f32 %v1317_v13, %v1317_v13 }
 0x141   :  { %260 = vadd.xlane.f32.xlu2 %v259_v36  ;;  %v267_v57 = vpop.xlane.xlu0 %266  ;;  %v88_v22 = vsel %vm74_vm2, %v87_v46, 0.0 }
 0x142   :  { %v392_v55 = vsel %vm258_vm1, %v356_v52, 0.0  ;;  %v316_v61 = vmul.f32 %v267_v57, %v1225_v1  ;;  %v371_v21 = vsel %vm258_vm1, %v349_v20, 0.0 }
 0x143   :  { %v282_v58 = vpop.xlane.xlu2 %281  ;;  %387 = vadd.xlane.f32.xlu0 %v386_v45  ;;  %393 = vadd.xlane.f32.xlu1 %v392_v55 }
 0x144   :  { %v321_v59 = vmul.f32 %v282_v58, %v1225_v1  ;;  %v1302_v3 = vsub.f32 %v1196_v42, %v316_v61 }
 0x146   :  { %v1291_v25 = vsub.f32 %v1180_v32, %v321_v59  ;;  %v348_v12 = vmul.f32 %v1302_v3, %v1302_v3 }
 0x148   :  { %v353_v2 = vmul.f32 %v1291_v25, %v1291_v25  ;;  %v368_v19 = vsel %vm258_vm1, %v348_v12, 0.0 }
 0x149   :  { %390 = vadd.xlane.f32.xlu2 %v389_v0 }
 0x14a   :  { %v383_v32 = vsel %vm258_vm1, %v353_v2, 0.0 }
 0x14b   :  { %378 = vadd.xlane.f32.xlu0 %v377_v5  ;;  %v273_v7 = vpop.xlane.xlu2 %272  ;;  %384 = vadd.xlane.f32.xlu1 %v383_v32 }
 0x14c   :  { %v318_v8 = vmul.f32 %v273_v7, %v1225_v1 }
 0x14e   :  { %v1312_v42 = vsub.f32 %v1221_v56, %v318_v8 }
 0x150   :  { %v350_v16 = vmul.f32 %v1312_v42, %v1312_v42 }
 0x151   :  { %381 = vadd.xlane.f32.xlu2 %v380_v14 }
 0x152   :  { %v374_v56 = vsel %vm258_vm1, %v350_v16, 0.0 }
 0x153   :  { %369 = vadd.xlane.f32.xlu0 %v368_v19  ;;  %375 = vadd.xlane.f32.xlu1 %v374_v56  ;;  %v1367_v56 = vld [vmem:[%s1707_s5] ss:$0 sm:$0xff] }
 0x159   :  { %372 = vadd.xlane.f32.xlu2 %v371_v21 }
 0x15b   :  { %89 = vadd.xlane.f32.xlu1 %v88_v22 }
 0x194   :  { %v400_v26 = vpop.xlane.xlu1 %399 }
 0x195   :  { %v422_v23 = vmul.f32 %v400_v26, %v1225_v1 }
 0x197   :  { %v438_v24 = vadd.f32 1e-05, %v422_v23 }
 0x199   :  { %920 = vrsqrt.f32 %v438_v24  ;;  %vm568_vm8 = vweird.f32 %v438_v24 }
 0x19c   :  { %v409_v27 = vpop.xlane.xlu0 %408 }
 0x19d   :  { %v425_v29 = vmul.f32 %v409_v27, %v1225_v1 }
 0x19f   :  { %v441_v33 = vadd.f32 1e-05, %v425_v29  ;;  %v1335_v35 = vpop.eup %920 }
 0x1a0   :  { %v563_v47 = vmul.f32 %v1335_v35, %v438_v24  ;;  %vm569_vm7 = vweird.f32 %v1335_v35 }
 0x1a1   :  { %922 = vrsqrt.f32 %v441_v33  ;;  %vm598_vm5 = vweird.f32 %v441_v33  ;;  %vm1380_vm10 = vmor %vm568_vm8, %vm569_vm7 }
 0x1a2   :  { %v564_v45 = vmul.f32 %v1335_v35, %v563_v47 }
 0x1a4   :  { %v264_v38 = vpop.xlane.xlu0 %263  ;;  %v406_v40 = vpop.xlane.xlu2 %405  ;;  %v565_v60 = vmul.f32 0.5, %v564_v45 }
 0x1a5   :  { %v315_v43 = vmul.f32 %v264_v38, %v1225_v1  ;;  %v424_v44 = vmul.f32 %v406_v40, %v1225_v1 }
 0x1a6   :  { %v566_v7 = vsub.f32 1.5, %v565_v60 }
 0x1a7   :  { %v923_v48 = vpop.eup %922  ;;  %v1341_v50 = vsub.f32 %v1184_v34, %v315_v43  ;;  %v440_v36 = vadd.f32 1e-05, %v424_v44 }
 0x1a8   :  { %v593_v52 = vmul.f32 %v923_v48, %v441_v33  ;;  %vm599_vm4 = vweird.f32 %v923_v48 }
 0x1a9   :  { %924 = vrsqrt.f32 %v440_v36  ;;  %v347_v53 = vmul.f32 %v1341_v50, %v1341_v50  ;;  %vm600_vm6 = vmor %vm598_vm5, %vm599_vm4  ;;  %vm588_vm11 = vweird.f32 %v440_v36 }
 0x1aa   :  { %v594_v55 = vmul.f32 %v923_v48, %v593_v52 }
 0x1ab   :  { %v365_v57 = vsel %vm258_vm1, %v347_v53, 0.0 }
 0x1ac   :  { %v595_v58 = vmul.f32 0.5, %v594_v55  ;;  %366 = vadd.xlane.f32.xlu2 %v365_v57  ;;  %v403_v41 = vpop.xlane.xlu2 %402 }
 0x1ad   :  { %v423_v59 = vmul.f32 %v403_v41, %v1225_v1 }
 0x1ae   :  { %v596_v61 = vsub.f32 1.5, %v595_v58  ;;  %v397_v34 = vpop.xlane.xlu0 %396 }
 0x1af   :  { %v925_v62 = vpop.eup %924  ;;  %v1348_v0 = vadd.f32 1e-05, %v423_v59  ;;  %v421_v2 = vmul.f32 %v397_v34, %v1225_v1 }
 0x1b0   :  { %v597_v5 = vmul.f32 %v923_v48, %v596_v61  ;;  %v583_v32 = vmul.f32 %v925_v62, %v440_v36  ;;  %vm589_vm9 = vweird.f32 %v925_v62 }
 0x1b1   :  { %926 = vrsqrt.f32 %v1348_v0  ;;  %v1352_v6 = vadd.f32 1e-05, %v421_v2  ;;  %vm1388_vm12 = vmor %vm588_vm11, %vm589_vm9  ;;  %vm578_vm14 = vweird.f32 %v1348_v0 }
 0x1b2   :  { %v584_v28 = vmul.f32 %v925_v62, %v583_v32  ;;  %v601_v8 = vsel %vm600_vm6, %v923_v48, %v597_v5 }
 0x1b3   :  { %928 = vrsqrt.f32 %v1352_v6  ;;  %v617_v10 = vmul.f32 %v601_v8, %v1234_v9  ;;  %v567_v9 = vmul.f32 %v1335_v35, %v566_v7  ;;  %vm558_vm3 = vweird.f32 %v1352_v6 }
 0x1b4   :  { %v585_v12 = vmul.f32 0.5, %v584_v28  ;;  %v261_v14 = vpop.xlane.xlu2 %260 }
 0x1b5   :  { %v314_v16 = vmul.f32 %v261_v14, %v1225_v1  ;;  %v636_v19 = vmul.f32 %v1359_v11, %v617_v10  ;;  %v571_v53 = vsel %vm1380_vm10, %v1335_v35, %v567_v9 }
 0x1b6   :  { %v586_v20 = vsub.f32 1.5, %v585_v12  ;;  %v388_v46 = vpop.xlane.xlu0 %387  ;;  %v394_v21 = vpop.xlane.xlu1 %393  ;;  %v614_v60 = vmul.f32 %v571_v53, %v1228_v4 }
 0x1b7   :  { %v1370_v22 = vpop.eup %926  ;;  %v1373_v26 = vsub.f32 %v1176_v30, %v314_v16  ;;  %v418_v23 = vmul.f32 %v388_v46, %v1225_v1  ;;  %v420_v27 = vmul.f32 %v394_v21, %v1225_v1  ;;  %v655_v29 = vadd.f32 %v1367_v56, %v636_v19 }
 0x1b8   :  { %v587_v24 = vmul.f32 %v925_v62, %v586_v20  ;;  %v573_v38 = vmul.f32 %v1370_v22, %v1348_v0  ;;  %vm579_vm13 = vweird.f32 %v1370_v22  ;;  %v633_v16 = vmul.f32 %v1359_v11, %v614_v60 }
 0x1b9   :  { %v1386_v40 = vpop.eup %928  ;;  %v1392_v43 = vadd.f32 1e-05, %v418_v23  ;;  %v1394_v44 = vadd.f32 1e-05, %v420_v27  ;;  %882 = vmatpush.xpose.msk.msra.mxu2 %vm258_vm1, %v655_v29  ;;  %773 = vmatpush.msrb.mxu3 %v655_v29  ;;  %v346_v47 = vmul.f32 %v1373_v26, %v1373_v26  ;;  %vm1425_vm15 = vmor %vm578_vm14, %vm579_vm13 }
 0x1ba   :  { %v591_v48 = vsel %vm1388_vm12, %v925_v62, %v587_v24  ;;  %v574_v36 = vmul.f32 %v1370_v22, %v573_v38  ;;  %v553_v52 = vmul.f32 %v1386_v40, %v1352_v6  ;;  %vm559_vm0 = vweird.f32 %v1386_v40 }
 0x1bb   :  { %930 = vrsqrt.f32 %v1392_v43  ;;  %v362_v45 = vsel %vm258_vm1, %v346_v47, 0.0  ;;  %v616_v41 = vmul.f32 %v591_v48, %v1242_v15  ;;  %vm1452_vm4 = vmor %vm558_vm3, %vm559_vm0  ;;  %v652_v47 = vadd.f32 %v1367_v56, %v633_v16 }
 0x1bc   :  { %v575_v55 = vmul.f32 0.5, %v574_v36  ;;  %v554_v57 = vmul.f32 %v1386_v40, %v553_v52  ;;  %932 = vrsqrt.f32 %v1394_v44  ;;  %363 = vadd.xlane.f32.xlu0 %v362_v45  ;;  %v391_v58 = vpop.xlane.xlu2 %390  ;;  %vm548_vm5 = vweird.f32 %v1394_v44 }
 0x1bd   :  { %v419_v59 = vmul.f32 %v391_v58, %v1225_v1  ;;  %v635_v2 = vmul.f32 %v1359_v11, %v616_v41  ;;  %vm528_vm7 = vweird.f32 %v1392_v43 }
 0x1be   :  { %v576_v61 = vsub.f32 1.5, %v575_v55  ;;  %v555_v35 = vmul.f32 0.5, %v554_v57  ;;  %v379_v34 = vpop.xlane.xlu0 %378  ;;  %v385_v62 = vpop.xlane.xlu1 %384 }
 0x1bf   :  { %v1416_v5 = vadd.f32 1e-05, %v419_v59  ;;  %v415_v32 = vmul.f32 %v379_v34, %v1225_v1  ;;  %v417_v7 = vmul.f32 %v385_v62, %v1225_v1  ;;  %v654_v4 = vadd.f32 %v1367_v56, %v635_v2 }
 0x1c0   :  { %v577_v15 = vmul.f32 %v1370_v22, %v576_v61  ;;  %v556_v28 = vsub.f32 1.5, %v555_v35 }
 0x1c1   :  { %v1423_v8 = vpop.eup %930  ;;  %934 = vrsqrt.f32 %v1416_v5  ;;  %v1430_v12 = vadd.f32 1e-05, %v415_v32  ;;  %v1432_v14 = vadd.f32 1e-05, %v417_v7  ;;  %883 = vmatpush.xpose.msk.msra.mxu2 %vm258_vm1, %v654_v4  ;;  %774 = vmatpush.msrb.mxu3 %v654_v4  ;;  %vm538_vm6 = vweird.f32 %v1416_v5 }
 0x1c2   :  { %v1435_v19 = vpop.eup %932  ;;  %v581_v0 = vsel %vm1425_vm15, %v1370_v22, %v577_v15  ;;  %v557_v9 = vmul.f32 %v1386_v40, %v556_v28  ;;  %v523_v20 = vmul.f32 %v1423_v8, %v1392_v43  ;;  %vm529_vm8 = vweird.f32 %v1423_v8 }
 0x1c3   :  { %v543_v46 = vmul.f32 %v1435_v19, %v1394_v44  ;;  %936 = vrsqrt.f32 %v1430_v12  ;;  %v615_v23 = vmul.f32 %v581_v0, %v1247_v18  ;;  %vm549_vm9 = vweird.f32 %v1435_v19  ;;  %vm1551_vm3 = vmor %vm528_vm7, %vm529_vm8 }
 0x1c4   :  { %v524_v21 = vmul.f32 %v1423_v8, %v523_v20  ;;  %938 = vrsqrt.f32 %v1432_v14  ;;  %v382_v22 = vpop.xlane.xlu2 %381  ;;  %v561_v48 = vsel %vm1452_vm4, %v1386_v40, %v557_v9  ;;  %vm518_vm10 = vweird.f32 %v1432_v14  ;;  %vm1515_vm13 = vmor %vm548_vm5, %vm549_vm9 }
 0x1c5   :  { %v544_v29 = vmul.f32 %v1435_v19, %v543_v46  ;;  %v416_v33 = vmul.f32 %v382_v22, %v1225_v1  ;;  %v634_v6 = vmul.f32 %v1359_v11, %v615_v23  ;;  %v613_v59 = vmul.f32 %v561_v48, %v1256_v31 }
 0x1c6   :  { %v525_v24 = vmul.f32 0.5, %v524_v21  ;;  %v370_v38 = vpop.xlane.xlu0 %369  ;;  %v376_v30 = vpop.xlane.xlu1 %375  ;;  %vm498_vm12 = vweird.f32 %v1430_v12  ;;  %v1016_v44 = vmov -1e+30  }
 0x1c7   :  { %v1463_v18 = vpop.eup %934  ;;  %v545_v36 = vmul.f32 0.5, %v544_v29  ;;  %v1466_v52 = vadd.f32 1e-05, %v416_v33  ;;  %v412_v53 = vmul.f32 %v370_v38, %v1225_v1  ;;  %v414_v55 = vmul.f32 %v376_v30, %v1225_v1 }
 0x1c8   :  { %v533_v45 = vmul.f32 %v1463_v18, %v1416_v5  ;;  %v653_v57 = vadd.f32 %v1367_v56, %v634_v6  ;;  %v526_v61 = vsub.f32 1.5, %v525_v24  ;;  %vm539_vm11 = vweird.f32 %v1463_v18 }
 0x1c9   :  { %v1474_v58 = vpop.eup %936  ;;  %v546_v40 = vsub.f32 1.5, %v545_v36  ;;  %940 = vrsqrt.f32 %v1466_v52  ;;  %v1477_v41 = vadd.f32 1e-05, %v412_v53  ;;  %v1495_v32 = vadd.f32 1e-05, %v414_v55  ;;  %vm1529_vm15 = vmor %vm538_vm6, %vm539_vm11 }
 0x1ca   :  { %v1480_v60 = vpop.eup %938  ;;  %v534_v35 = vmul.f32 %v1463_v18, %v533_v45  ;;  %v493_v34 = vmul.f32 %v1474_v58, %v1430_v12  ;;  %884 = vmatpush.xpose.msk.msra.mxu2 %vm258_vm1, %v653_v57  ;;  %775 = vmatpush.msrb.mxu3 %v653_v57  ;;  %v632_v10 = vmul.f32 %v1359_v11, %v613_v59  ;;  %vm508_vm0 = vweird.f32 %v1466_v52 }
 0x1cb   :  { %v513_v31 = vmul.f32 %v1480_v60, %v1432_v14  ;;  %942 = vrsqrt.f32 %v1477_v41  ;;  %v547_v15 = vmul.f32 %v1435_v19, %v546_v40  ;;  %v527_v16 = vmul.f32 %v1423_v8, %v526_v61 }
 0x1cc   :  { %v535_v62 = vmul.f32 0.5, %v534_v35  ;;  %v494_v2 = vmul.f32 %v1474_v58, %v493_v34  ;;  %776 = vmatpush.msrb.mxu3 %v652_v47  ;;  %v373_v7 = vpop.xlane.xlu2 %372  ;;  %944 = vrsqrt.f32 %v1495_v32  ;;  %v651_v23 = vadd.f32 %v1367_v56, %v632_v10 }
 0x1cd   :  { %v514_v28 = vmul.f32 %v1480_v60, %v513_v31  ;;  %v413_v4 = vmul.f32 %v373_v7, %v1225_v1  ;;  %vm519_vm14 = vweird.f32 %v1480_v60  ;;  %v551_v48 = vsel %vm1515_vm13, %v1435_v19, %v547_v15 }
 0x1ce   :  { %v536_v0 = vsub.f32 1.5, %v535_v62  ;;  %v495_v9 = vmul.f32 0.5, %v494_v2  ;;  %885 = vmatpush.xpose.msk.msra.mxu2 %vm258_vm1, %v652_v47  ;;  %v90_v20 = vpop.xlane.xlu1 %89  ;;  %777 = vmatpush.msrb.mxu3 %v651_v23  ;;  %vm499_vm4 = vweird.f32 %v1474_v58  ;;  %vm1565_vm5 = vmor %vm518_vm10, %vm519_vm14  ;;  %v612_v59 = vmul.f32 %v551_v48, %v1269_v49 }
 0x1cf   :  { %v1505_v46 = vpop.eup %940  ;;  %v515_v21 = vmul.f32 0.5, %v514_v28  ;;  %v1507_v22 = vadd.f32 1e-05, %v413_v4  ;;  %v91_v27 = vmul.f32 %v90_v20, %v1225_v1  ;;  %vm468_vm6 = vweird.f32 %v1477_v41  ;;  %vm1589_vm7 = vmor %vm498_vm12, %vm499_vm4 }
 0x1d0   :  { %v537_v33 = vmul.f32 %v1463_v18, %v536_v0  ;;  %v496_v24 = vsub.f32 1.5, %v495_v9  ;;  %v503_v38 = vmul.f32 %v1505_v46, %v1466_v52  ;;  %v531_v14 = vsel %vm1551_vm3, %v1423_v8, %v527_v16 }
 0x1d1   :  { %v1523_v30 = vpop.eup %942  ;;  %v516_v6 = vsub.f32 1.5, %v515_v21  ;;  %946 = vrsqrt.f32 %v1507_v22  ;;  %v1534_v47 = vadd.f32 1e-05, %v91_v27  ;;  %v631_v2 = vmul.f32 %v1359_v11, %v612_v59 }
 0x1d2   :  { %v541_v36 = vsel %vm1529_vm15, %v1463_v18, %v537_v33  ;;  %v504_v5 = vmul.f32 %v1505_v46, %v503_v38  ;;  %v463_v53 = vmul.f32 %v1523_v30, %v1477_v41  ;;  %886 = vmatpush.xpose.msk.msra.mxu2 %vm258_vm1, %v651_v23  ;;  %v497_v19 = vmul.f32 %v1474_v58, %v496_v24  ;;  %v1559_v55 = vpop.eup %944 }
 0x1d3   :  { %v517_v18 = vmul.f32 %v1480_v60, %v516_v6  ;;  %948 = vrsqrt.f32 %v1534_v47  ;;  %v611_v61 = vmul.f32 %v541_v36, %v1274_v51  ;;  %v483_v35 = vmul.f32 %v1559_v55, %v1495_v32 }
 0x1d4   :  { %v505_v57 = vmul.f32 0.5, %v504_v5  ;;  %v464_v40 = vmul.f32 %v1523_v30, %v463_v53  ;;  %vm509_vm8 = vweird.f32 %v1505_v46  ;;  %v501_v12 = vsel %vm1589_vm7, %v1474_v58, %v497_v19 }
 0x1d5   :  { %v521_v34 = vsel %vm1565_vm5, %v1480_v60, %v517_v18  ;;  %v630_v49 = vmul.f32 %v1359_v11, %v611_v61  ;;  %v484_v8 = vmul.f32 %v1559_v55, %v483_v35  ;;  %v610_v60 = vmul.f32 %v531_v14, %v1262_v39  ;;  %vm510_vm9 = vmor %vm508_vm0, %vm509_vm8 }
 0x1d6   :  { %v506_v31 = vsub.f32 1.5, %v505_v57  ;;  %v465_v62 = vmul.f32 0.5, %v464_v40  ;;  %v609_v15 = vmul.f32 %v521_v34, %v1291_v25  ;;  %v650_v9 = vadd.f32 %v1367_v56, %v631_v2  ;;  %v28_v34 = vld [vmem:[%s1707_s5] sm:$0x1] }
 0x1d7   :  { %v1583_v51 = vpop.eup %946  ;;  %v485_v0 = vmul.f32 0.5, %v484_v8  ;;  %v649_v20 = vadd.f32 %v1367_v56, %v630_v49  ;;  %v629_v39 = vmul.f32 %v1359_v11, %v610_v60  ;;  %vm469_vm10 = vweird.f32 %v1523_v30 }
 0x1d8   :  { %v507_v28 = vmul.f32 %v1505_v46, %v506_v31  ;;  %v466_v4 = vsub.f32 1.5, %v465_v62  ;;  %v473_v10 = vmul.f32 %v1583_v51, %v1507_v22  ;;  %vm489_vm11 = vweird.f32 %v1559_v55  ;;  %778 = vmatpush.msrb.mxu3 %v650_v9  ;;  %887 = vmatpush.xpose.msk.msra.mxu2 %vm258_vm1, %v650_v9  ;;  %vm1620_vm12 = vmor %vm468_vm6, %vm469_vm10 }
 0x1d9   :  { %v949_v16 = vpop.eup %948  ;;  %v486_v58 = vsub.f32 1.5, %v485_v0  ;;  %v628_v27 = vmul.f32 %v1359_v11, %v609_v15  ;;  %v607_v38 = vmul.f32 %v501_v12, %v1281_v54  ;;  %vm488_vm13 = vweird.f32 %v1495_v32 }
 0x1da   :  { %v467_v25 = vmul.f32 %v1523_v30, %v466_v4  ;;  %v474_v21 = vmul.f32 %v1583_v51, %v473_v10  ;;  %v94_v23 = vmul.f32 %v949_v16, %v1534_v47  ;;  %v511_v29 = vsel %vm510_vm9, %v1505_v46, %v507_v28  ;;  %779 = vmatpush.msrb.mxu3 %v649_v20  ;;  %vm1630_vm15 = vmor %vm488_vm13, %vm489_vm11 }
 0x1db   :  { %v608_v24 = vmul.f32 %v511_v29, %v1296_v63  ;;  %v487_v6 = vmul.f32 %v1559_v55, %v486_v58  ;;  %vm479_vm14 = vweird.f32 %v1583_v51  ;;  %v648_v46 = vadd.f32 %v1367_v56, %v629_v39 }
 0x1dc   :  { %v475_v52 = vmul.f32 0.5, %v474_v21  ;;  %v95_v33 = vmul.f32 %v949_v16, %v94_v23  ;;  %v471_v36 = vsel %vm1620_vm12, %v1523_v30, %v467_v25  ;;  %vm478_vm0 = vweird.f32 %v1507_v22  ;;  %888 = vmatpush.xpose.msk.msra.mxu2 %vm258_vm1, %v649_v20 }
 0x1dd   :  { %v627_v48 = vmul.f32 %v1359_v11, %v608_v24  ;;  %780 = vmatpush.msrb.mxu3 %v648_v46  ;;  %v647_v32 = vadd.f32 %v1367_v56, %v628_v27  ;;  %v626_v5 = vmul.f32 %v1359_v11, %v607_v38  ;;  %v491_v53 = vsel %vm1630_vm15, %v1559_v55, %v487_v6  ;;  %vm480_vm4 = vmor %vm478_vm0, %vm479_vm14 }
 0x1de   :  { %v476_v54 = vsub.f32 1.5, %v475_v52  ;;  %v96_v41 = vmul.f32 0.5, %v95_v33  ;;  %vm100_vm3 = vweird.f32 %v949_v16  ;;  %v606_v22 = vmul.f32 %v491_v53, %v1312_v42  ;;  %v27_v42 = vld [vmem:[%s1706_s4] sm:$0x1]  ;;  %s1018_s4 = smov [#allocation6]  }
 0x1df   :  { %v646_v18 = vadd.f32 %v1367_v56, %v627_v48  ;;  %781 = vmatpush.msrb.mxu3 %v647_v32  ;;  %v604_v30 = vmul.f32 %v471_v36, %v1302_v3  ;;  %vm99_vm5 = vweird.f32 %v1534_v47  ;;  %v645_v55 = vadd.f32 %v1367_v56, %v626_v5  ;;  %s829_s5 = sshll.u32 %s1018_s4, 4  ;;  %s830_s5 = int_to_ptr.vmem [resolvable:$true] %s829_s5 }
 0x1e0   :  { %v477_v45 = vmul.f32 %v1583_v51, %v476_v54  ;;  %v97_v19 = vsub.f32 1.5, %v96_v41  ;;  %vm101_vm6 = vmor %vm99_vm5, %vm100_vm3  ;;  %889 = vmatpush.xpose.msk.msra.mxu2 %vm258_vm1, %v648_v46  ;;  %v625_v40 = vmul.f32 %v1359_v11, %v606_v22  ;;  %vm108_vm13 = vcmask 0  }
 0x1e1   :  { %782 = vmatpush.msrb.mxu3 %v646_v18  ;;  %v623_v14 = vmul.f32 %v1359_v11, %v604_v30  ;;  %109 = vst.msk [vmem:[#allocation3] sm:$0x1] %vm108_vm13, %v1016_v44  ;;  %v729_v6 = vlaneseq  ;;  %vm740_vm15 = vcmask 1040384   ;;  %v1017_v63 = vmov 0  }
 0x1e2   :  { %v98_v43 = vmul.f32 %v949_v16, %v97_v19  ;;  %v481_v57 = vsel %vm480_vm4, %v1583_v51, %v477_v45  ;;  %v644_v47 = vadd.f32 %v1367_v56, %v625_v40  ;;  %110 = vst.msk [vmem:[#allocation4] sm:$0x1] %vm108_vm13, %v1014_v37  ;;  %913 = vset.pattern.permute.xlu2 %v1017_v63 }
 0x1e3   :  { %v605_v59 = vmul.f32 %v481_v57, %v1317_v13  ;;  %783 = vmatpush.msrb.mxu3 %v645_v55  ;;  %v730_v46 = vand.u32 127, %v729_v6  ;;  %914 = vset.pattern.permute.xlu1 %v1017_v63 }
 0x1e4   :  { %v102_v3 = vsel %vm101_vm6, %v949_v16, %v98_v43  ;;  %890 = vmatpush.xpose.msk.msra.mxu2 %vm258_vm1, %v647_v32  ;;  %915 = vset.pattern.permute.xlu0 %v1017_v63 }
 0x1e5   :  { %v103_v61 = vmul.f32 %v102_v3, %v1323_v17  ;;  %v624_v35 = vmul.f32 %v1359_v11, %v605_v59  ;;  %784 = vmatpush.msrb.mxu3 %v644_v47  ;;  %v642_v17 = vadd.f32 %v1367_v56, %v623_v14  ;;  %vm733_vm14 = vcmp.lt.s32.totalorder %v730_v46, 8 }
 0x1e7   :  { %v104_v31 = vmul.f32 %v103_v61, %v27_v42  ;;  %v643_v13 = vadd.f32 %v1367_v56, %v624_v35  ;;  %v765_v61 = vld [vmem:[#allocation5] sm:$0x1] }
 0x1e8   :  { %891 = vmatpush.xpose.msk.msra.mxu2 %vm258_vm1, %v646_v18  ;;  %v739_v54 = vld [vmem:[#allocation3] sm:$0x1] }
 0x1e9   :  { %v105_v62 = vadd.f32 %v104_v31, %v28_v34  ;;  %785 = vmatpush.msrb.mxu3 %v643_v13  ;;  %v757_v43 = vld [vmem:[#allocation4] sm:$0x1] }
 0x1eb   :  { %v106_v2 = vmul.f32 0.17677669, %v105_v62  ;;  %786 = vmatpush.msrb.mxu3 %v642_v17 }
 0x1ec   :  { %892 = vmatpush.xpose.msk.msra.mxu2 %vm258_vm1, %v645_v55 }
 0x1ed   :  { %107 = vst.msk [vmem:[#allocation2] sm:$0x1] %vm74_vm2, %v106_v2 }
 0x1f0   :  { %893 = vmatpush.xpose.msk.msra.mxu2 %vm258_vm1, %v644_v47 }
 0x1f4   :  { %894 = vmatpush.xpose.msk.msra.mxu2 %vm258_vm1, %v643_v13  ;;  %v656_v38 = vld [vmem:[#allocation2] sm:$0x1] }
 0x1f8   :  { %895 = vmatpush.xpose.msk.msra.mxu2 %vm258_vm1, %v642_v17 }
 0x21f   :  { %v367_v49 = vpop.xlane.xlu2 %366 }
 0x220   :  { %v411_v51 = vmul.f32 %v367_v49, %v1225_v1 }
 0x222   :  { %v427_v7 = vadd.f32 1e-05, %v411_v51 }
 0x224   :  { %950 = vrsqrt.f32 %v427_v7  ;;  %vm458_vm8 = vweird.f32 %v427_v7 }
 0x22a   :  { %v951_v8 = vpop.eup %950 }
 0x22b   :  { %v453_v60 = vmul.f32 %v951_v8, %v427_v7  ;;  %vm459_vm7 = vweird.f32 %v951_v8 }
 0x22c   :  { %vm460_vm9 = vmor %vm458_vm8, %vm459_vm7 }
 0x22d   :  { %v454_v15 = vmul.f32 %v951_v8, %v453_v60 }
 0x22f   :  { %v455_v28 = vmul.f32 0.5, %v454_v15  ;;  %v364_v4 = vpop.xlane.xlu0 %363 }
 0x230   :  { %v410_v10 = vmul.f32 %v364_v4, %v1225_v1 }
 0x231   :  { %v456_v12 = vsub.f32 1.5, %v455_v28 }
 0x232   :  { %v426_v16 = vadd.f32 1e-05, %v410_v10 }
 0x233   :  { %v457_v0 = vmul.f32 %v951_v8, %v456_v12 }
 0x234   :  { %952 = vrsqrt.f32 %v426_v16  ;;  %vm448_vm11 = vweird.f32 %v426_v16 }
 0x235   :  { %v461_v9 = vsel %vm460_vm9, %v951_v8, %v457_v0 }
 0x236   :  { %v603_v20 = vmul.f32 %v461_v9, %v1341_v50 }
 0x238   :  { %v622_v39 = vmul.f32 %v1359_v11, %v603_v20 }
 0x23a   :  { %v953_v25 = vpop.eup %952  ;;  %v641_v21 = vadd.f32 %v1367_v56, %v622_v39 }
 0x23b   :  { %v443_v23 = vmul.f32 %v953_v25, %v426_v16  ;;  %vm449_vm10 = vweird.f32 %v953_v25 }
 0x23c   :  { %896 = vmatpush.xpose.msk.msra.mxu2 %vm258_vm1, %v641_v21  ;;  %787 = vmatpush.msrb.mxu3 %v641_v21  ;;  %vm450_vm12 = vmor %vm448_vm11, %vm449_vm10 }
 0x23d   :  { %v444_v1 = vmul.f32 %v953_v25, %v443_v23 }
 0x23f   :  { %v445_v58 = vmul.f32 0.5, %v444_v1 }
 0x241   :  { %v446_v27 = vsub.f32 1.5, %v445_v58 }
 0x243   :  { %v447_v29 = vmul.f32 %v953_v25, %v446_v27 }
 0x245   :  { %v451_v52 = vsel %vm450_vm12, %v953_v25, %v447_v29 }
 0x246   :  { %v602_v33 = vmul.f32 %v451_v52, %v1373_v26 }
 0x248   :  { %v621_v50 = vmul.f32 %v1359_v11, %v602_v33 }
 0x24a   :  { %v640_v24 = vadd.f32 %v1367_v56, %v621_v50 }
 0x24c   :  { %897 = vmatpush.xpose.msk.msra.mxu2 %vm258_vm1, %v640_v24  ;;  %788 = vmatpush.msrb.mxu3 %v640_v24 }
 0x24f   :  { %898 = vmatmul.msk.f32.vlgmr.msra.gmra.mxu2 %vm258_vm1, %v656_v38 }
 0x2d2   :  { %v725_v11 = vpop.f32.mrf.mxu2 }
 0x2d3   :  { %v734_v26 = vsel %vm733_vm14, %v725_v11, -1e+30 }
 0x2d4   :  { %738 = vst [vmem:[#allocation6] sm:$0x1] %v734_v26  ;;  %v741_v56 = vsel %vm740_vm15, %v734_v26, -inf }
 0x2d5   :  { %742 = vmax.xlane.f32.xlu1 %v741_v56 }
 0x2db   :  { %v802_v62 = vld [vmem:[#allocation6] sm:$0x1] }
 0x348   :  { %v743_v41 = vpop.xlane.xlu1 %742 }
 0x349   :  { %v744_v48 = vmax.f32 %v739_v54, %v743_v41 }
 0x34b   :  { %v745_v36 = vsub.f32 %v739_v54, %v744_v48  ;;  %796 = vst.msk [vmem:[#allocation3] sm:$0x1] %vm108_vm13, %v744_v48  ;;  %750 = vperm.xlu2 %913, %v744_v48  }
 0x34d   :  { %v746_v37 = vmul.f32 1.442695, %v745_v36 }
 0x34f   :  { %954 = vpow2.f32 %v746_v37 }
 0x352   :  { %v803_v30 = vld [vmem:[#allocation3] sm:$0x1] }
 0x355   :  { %v955_v32 = vpop.eup %954 }
 0x356   :  { %768 = vperm.xlu1 %914, %v955_v32   ;;  %v758_v57 = vmul.f32 %v955_v32, %v757_v43 }
 0x3a5   :  { %v751_v5 = vpop.permute.xlu2 %750 }
 0x3a6   :  { %v753_v53 = vperm.slane %v751_v5, 0 }
 0x3a8   :  { %v754_v45 = vsub.f32 %v734_v26, %v753_v53 }
 0x3aa   :  { %v755_v19 = vmul.f32 1.442695, %v754_v45 }
 0x3ac   :  { %956 = vpow2.f32 %v755_v19 }
 0x3b2   :  { %v957_v18 = vpop.eup %956 }
 0x3b3   :  { %789 = vmatmul.f32.vlgmr.msrb.gmra.mxu3 %v957_v18  ;;  %v759_v22 = vsel %vm740_vm15, %v957_v18, 0.0 }
 0x3b4   :  { %760 = vadd.xlane.f32.xlu0 %v759_v22 }
 0x3c8   :  { %806 = vperm.xlu0 %915, %v803_v30   ;;  %v769_v59 = vpop.permute.xlu1 %768 }
 0x3c9   :  { %v771_v42 = vperm.slane %v769_v59, 0 }
 0x3cb   :  { %v772_v47 = vmul.f32 %v771_v42, %v765_v61 }
 0x427   :  { %v761_v55 = vpop.xlane.xlu0 %760 }
 0x428   :  { %v762_v40 = vadd.f32 %v761_v55, %v758_v57 }
 0x42a   :  { %764 = vst.msk [vmem:[#allocation4] sm:$0x1] %vm108_vm13, %v762_v40 }
 0x431   :  { %v800_v3 = vld [vmem:[#allocation4] sm:$0x1] }
 0x432   :  { %958 = vrcp.f32 %v800_v3 }
 0x436   :  { %v790_v35 = vpop.f32.mrf.mxu3 }
 0x437   :  { %v793_v14 = vadd.f32 %v790_v35, %v772_v47 }
 0x438   :  { %v959_v34 = vpop.eup %958 }
 0x439   :  { %795 = vst.msk [vmem:[#allocation5] sm:$0x1] %vm74_vm2, %v793_v14  ;;  %815 = vperm.xlu2 %913, %v959_v34  }
 0x43a   :  { %v807_v31 = vpop.permute.xlu0 %806 }
 0x43b   :  { %v809_v13 = vperm.slane %v807_v31, 0 }
 0x43d   :  { %v810_v17 = vsub.f32 %v802_v62, %v809_v13 }
 0x43f   :  { %v811_v2 = vmul.f32 1.442695, %v810_v17 }
 0x440   :  { %v821_v8 = vld [vmem:[#allocation5] sm:$0x1] }
 0x441   :  { %960 = vpow2.f32 %v811_v2 }
 0x447   :  { %v961_v7 = vpop.eup %960 }
 0x493   :  { %v816_v49 = vpop.permute.xlu2 %815 }
 0x494   :  { %v818_v51 = vperm.slane %v816_v49, 0 }
 0x496   :  { %v819_v60 = vmul.f32 %v961_v7, %v818_v51  ;;  %v822_v15 = vmul.f32 %v821_v8, %v818_v51 }
 0x498   :  { %820 = vst [vmem:[#allocation6] sm:$0x1] %v819_v60 }
 0x499   :  { %823 = vst.msk [vmem:[#allocation8] sm:$0x1] %vm74_vm2, %v822_v15  ;;  %834 = dma.vmem_to_hbm [thread:$0]  %s830_s5, 16, %s832_s8, [#allocation7]  }
 0x49a   :  { %845 = dma.vmem_to_hbm [thread:$0]  %s841_s10, 16, %s843_s13, [#allocation9]  }
 0x49b   :  { %1010 = dma.done.wait [#allocation7], 16  }
 0x49c   :  { %1011 = vsyncadd [#allocation7], 4294967280 }
 0x49d   :  { %1012 = dma.done.wait [#allocation9], 16  }
 0x49e   :  { %1013 = vsyncadd [#allocation9], 4294967280 }
 0x49f   :  { %854 = vsyncpa [#allocation7], 1 }
 0x4a0   :  { %855 = vsyncpa [#allocation9], 1 }

</bundles_post_ra>
